<compile_context>
chip_gen: v7x
topology: tpu7x:2x2x1
jax: 0.10.0
libtpu: 0.0.40
codegen_flags: <defaults>
</compile_context>

<pallas_src>
import functools

import jax
import jax.numpy as jnp
from jax.experimental import pallas as pl
from jax.experimental.pallas import tpu as pltpu


def _odd_net_kernel(inp_ref, vecs_ref, w2_ref, w3_ref, out_ref):
    # inp_ref : (TB, 2)    columns [x, y]
    # vecs_ref: (6, 2N)    rows 0-1 = W1 = [[w11|w11], [w13|-w13]]
    #                      row 2 = [b11|b11], row 3 = [b21+b23|b21+b23]
    #                      row 4 = w41 row,  row 5 = [b41, 0, ..., 0]
    # w2_ref  : (2N, 2N)   [[w21, w23], [w23, w21]]
    # w3_ref  : (2N, 2N)   [[w31], [-w31]]            (fc3 biases cancel)
    # out_ref : (1, TB)    lane-dense output row for this batch tile
    xy = inp_ref[...]                                  # (TB, 2) f32

    w1 = vecs_ref[0:2, :]                              # (2, 2N)
    b1 = vecs_ref[2:3, :]                              # (1, 2N) sublane-broadcast
    b2 = vecs_ref[3:4, :]                              # (1, 2N)
    w4 = vecs_ref[4:5, :]                              # (1, 2N)
    b41 = vecs_ref[5:6, 0:1]                           # (1, 1)

    # Stage 1: fc1_1 / fc1_3 fused into one small MXU matmul (K = 2).
    u1 = jnp.tanh(jnp.dot(xy, w1, preferred_element_type=jnp.float32) + b1)

    # Stage 2: the four fc2 matmuls fused into one (TB,2N)x(2N,2N) matmul.
    u2 = jnp.tanh(
        jnp.dot(u1, w2_ref[...], preferred_element_type=jnp.float32) + b2
    )

    # Stage 3: fc3_1 with bias cancellation; sign-folded W3 gives (u2_1-u2_2)@w31.
    u3 = jnp.tanh(jnp.dot(u2, w3_ref[...], preferred_element_type=jnp.float32))

    # Stage 4: fc4_1 as a transposed contraction -> lane-dense (1, TB) row.
    # (If pl.lower_as_mlir ever shows a full-slab vxpose feeding this at very
    #  large block_b, switch to the feature-major dataflow per the review; at
    #  these sizes the kernel is per-call/per-step overhead bound.)
    u_row = jax.lax.dot_general(
        w4, u3,
        dimension_numbers=(((1,), (1,)), ((), ())),    # contract feature axes
        preferred_element_type=jnp.float32,
    )                                                  # (1, TB)
    out_ref[...] = (u_row + b41).astype(out_ref.dtype)


def _pick_block_b(batch):
    """Batch-tile picker: the largest tile that divides `batch`, is a multiple
    of 128, is capped at 4096 rows, and (for batch > 1024) leaves >= 2 grid
    steps so ("parallel",) shards the grid across v7x's two TensorCores."""
    if batch <= 1024:
        return batch
    cap = min(4096, batch // 2)
    cap -= cap % 128
    for cand in range(cap, 127, -128):
        if batch % cand == 0:
            return cand
    return 128


@functools.partial(jax.jit, static_argnames=("block_b",))
def odd_net_forward(inp, vecs, w2, w3, *, block_b=None):
    """inp: (B, 2) float32, B a multiple of 128 (pad on host). Returns (B, 1)."""
    B = inp.shape[0]
    two_n = vecs.shape[1]
    assert B % 128 == 0, "pad the batch to a multiple of 128 on the host"
    if block_b is None:
        block_b = _pick_block_b(B)
    assert block_b % 128 == 0 and B % block_b == 0, (
        "block_b must be a multiple of 128 that divides the (padded) batch"
    )

    grid = (B // block_b,)

    out_row = pl.pallas_call(
        _odd_net_kernel,
        out_shape=jax.ShapeDtypeStruct((1, B), jnp.float32),
        grid_spec=pltpu.PrefetchScalarGridSpec(
            num_scalar_prefetch=0,
            grid=grid,
            in_specs=[
                pl.BlockSpec((block_b, 2), lambda i: (i, 0)),      # batch tile
                pl.BlockSpec((6, two_n), lambda i: (0, 0)),        # packed rows
                pl.BlockSpec((two_n, two_n), lambda i: (0, 0)),    # fused W2
                pl.BlockSpec((two_n, two_n), lambda i: (0, 0)),    # fused W3
            ],
            out_specs=pl.BlockSpec((1, block_b), lambda i: (0, i)),  # lane-dense
        ),
        compiler_params=pltpu.CompilerParams(
            dimension_semantics=("parallel",),
        ),
    )(inp, vecs, w2, w3)
    return out_row.reshape(B, 1)


def init_params(node_num, key):
    """Deterministic init mimicking nn.Linear uniform(-1/sqrt(fan_in), +).

    Weights stored as (in_features, out_features); biases as (1, out_features).
    """
    N = 2 * node_num  # self.node_num in the torch module

    def linear(key, fan_in, fan_out, bias=True):
        kw, kb = jax.random.split(key)
        bound = 1.0 / jnp.sqrt(float(fan_in))
        w = jax.random.uniform(kw, (fan_in, fan_out), jnp.float32, -bound, bound)
        if not bias:
            return w, None
        b = jax.random.uniform(kb, (1, fan_out), jnp.float32, -bound, bound)
        return w, b

    keys = jax.random.split(key, 6)
    w11, b11 = linear(keys[0], 1, N)
    w13, _ = linear(keys[1], 1, N, bias=False)
    w21, b21 = linear(keys[2], N, N)
    w23, b23 = linear(keys[3], N, N)
    w31, b31 = linear(keys[4], N, 2 * N)
    w41, b41 = linear(keys[5], 2 * N, 1)
    return dict(
        w11=w11, b11=b11, w13=w13,
        w21=w21, b21=b21, w23=w23, b23=b23,
        w31=w31, b31=b31, w41=w41, b41=b41,
    )


def pack_params(p):
    """Host-side packing of the 12 torch tensors into 3 kernel operands."""
    N = p["w21"].shape[0]          # torch module's self.node_num
    two_n = 2 * N
    b2row = p["b21"] + p["b23"]                               # (1, N)
    b41row = jnp.pad(p["b41"], ((0, 0), (0, two_n - 1)))      # (1, 2N), b41 in lane 0
    vecs = jnp.concatenate(
        [
            jnp.concatenate([p["w11"], p["w11"]], axis=1),    # [w11 | w11]
            jnp.concatenate([p["w13"], -p["w13"]], axis=1),   # [w13 | -w13]
            jnp.concatenate([p["b11"], p["b11"]], axis=1),    # [b11 | b11]
            jnp.concatenate([b2row, b2row], axis=1),          # fused fc2 bias
            p["w41"].T,                                       # (1, 2N) fc4 row
            b41row,                                           # fc4 bias
        ],
        axis=0,
    ).astype(jnp.float32)                                     # (6, 2N)
    w2 = jnp.block([[p["w21"], p["w23"]],
                    [p["w23"], p["w21"]]]).astype(jnp.float32)           # (2N, 2N)
    w3 = jnp.concatenate([p["w31"], -p["w31"]], axis=0).astype(jnp.float32)  # (2N, 2N)
    return vecs, w2, w3


def reference_forward(inp, p):
    """Pure-JAX reference mirroring the PyTorch forward exactly.

    Precision.HIGHEST keeps the f32 matmuls truly f32 on TPU so the 1e-5
    comparison against the (f32-accurate) Pallas kernel is meaningful.
    """
    hi = jax.lax.Precision.HIGHEST
    dot = lambda a, b: jnp.dot(a, b, precision=hi)
    x, y = inp[:, 0:1], inp[:, 1:2]
    f11 = dot(x, p["w11"]) + p["b11"]
    f13 = dot(y, p["w13"])
    u1_1 = jnp.tanh(f11 + f13)
    u1_2 = jnp.tanh(f11 - f13)
    u2_1 = jnp.tanh((dot(u1_1, p["w21"]) + p["b21"]) + (dot(u1_2, p["w23"]) + p["b23"]))
    u2_2 = jnp.tanh((dot(u1_1, p["w23"]) + p["b23"]) + (dot(u1_2, p["w21"]) + p["b21"]))
    u3_1 = jnp.tanh((dot(u2_1, p["w31"]) + p["b31"]) - (dot(u2_2, p["w31"]) + p["b31"]))
    return dot(u3_1, p["w41"]) + p["b41"]


if __name__ == "__main__":
    node_num = 16        # torch module doubles it internally -> slab width 64
    batch = 128          # multiple of 128 -> single grid step, lane-dense store

    key = jax.random.PRNGKey(0)
    k_inp, k_par = jax.random.split(key)

    inp = jax.random.normal(k_inp, (batch, 2), dtype=jnp.float32)
    params = init_params(node_num, k_par)
    vecs, w2, w3 = pack_params(params)

    out = odd_net_forward(inp, vecs, w2, w3)
    out = jax.block_until_ready(out)

    ref = reference_forward(inp, params)
    assert out.shape == (batch, 1)
    assert jnp.allclose(out, ref, atol=1e-5, rtol=1e-5), "Pallas output mismatch"

    print("KERNEL_OK")
</pallas_src>

<mosaic_0001>
module attributes {stable_mosaic.version = 11 : i64} {
  func.func @_odd_net_kernel(%arg0: i32, %arg1: memref<128x2xf32, #tpu.memory_space<vmem>>, %arg2: memref<6x64xf32, #tpu.memory_space<vmem>>, %arg3: memref<64x64xf32, #tpu.memory_space<vmem>>, %arg4: memref<64x64xf32, #tpu.memory_space<vmem>>, %arg5: memref<1x128xf32, #tpu.memory_space<vmem>>) attributes {dimension_semantics = [#tpu.dimension_semantics<parallel>], iteration_bounds = array<i64: 1>, scalar_prefetch = 0 : i64, scratch_operands = 0 : i64, tpu.core_type = #tpu.core_type<tc>, window_params = [{transform_indices = @transform_0, window_bounds = array<i64: 128, 2>}, {pipeline_mode = #tpu.pipeline_mode<synchronous>, transform_indices = @transform_1, window_bounds = array<i64: 6, 64>}, {pipeline_mode = #tpu.pipeline_mode<synchronous>, transform_indices = @transform_2, window_bounds = array<i64: 64, 64>}, {pipeline_mode = #tpu.pipeline_mode<synchronous>, transform_indices = @transform_3, window_bounds = array<i64: 64, 64>}, {transform_indices = @transform_4, window_bounds = array<i64: 1, 128>}]} {
    %c0 = arith.constant 0 : index
    %c0_0 = arith.constant 0 : index
    %0 = vector.load %arg1[%c0, %c0_0] : memref<128x2xf32, #tpu.memory_space<vmem>>, vector<128x2xf32>
    %c0_1 = arith.constant 0 : index
    %c0_2 = arith.constant 0 : index
    %1 = vector.load %arg2[%c0_1, %c0_2] : memref<6x64xf32, #tpu.memory_space<vmem>>, vector<2x64xf32>
    %c2 = arith.constant 2 : index
    %c0_3 = arith.constant 0 : index
    %2 = vector.load %arg2[%c2, %c0_3] : memref<6x64xf32, #tpu.memory_space<vmem>>, vector<1x64xf32>
    %c3 = arith.constant 3 : index
    %c0_4 = arith.constant 0 : index
    %3 = vector.load %arg2[%c3, %c0_4] : memref<6x64xf32, #tpu.memory_space<vmem>>, vector<1x64xf32>
    %c4 = arith.constant 4 : index
    %c0_5 = arith.constant 0 : index
    %4 = vector.load %arg2[%c4, %c0_5] : memref<6x64xf32, #tpu.memory_space<vmem>>, vector<1x64xf32>
    %c5 = arith.constant 5 : index
    %c0_6 = arith.constant 0 : index
    %5 = vector.load %arg2[%c5, %c0_6] : memref<6x64xf32, #tpu.memory_space<vmem>>, vector<1x1xf32>
    %cst = arith.constant dense<0.000000e+00> : vector<128x64xf32>
    %6 = tpu.matmul %0, %1, %cst {dimension_numbers = #tpu.dot_dimension_numbers<[1], [0], [0], [1], [0, 0, 1, 1], [], []>} : vector<128x2xf32>, vector<2x64xf32>, vector<128x64xf32> -> vector<128x64xf32>
    %7 = vector.broadcast %2 : vector<1x64xf32> to vector<128x64xf32>
    %8 = arith.addf %6, %7 : vector<128x64xf32>
    %9 = math.tanh %8 : vector<128x64xf32>
    %c0_7 = arith.constant 0 : index
    %c0_8 = arith.constant 0 : index
    %10 = vector.load %arg3[%c0_7, %c0_8] : memref<64x64xf32, #tpu.memory_space<vmem>>, vector<64x64xf32>
    %cst_9 = arith.constant dense<0.000000e+00> : vector<128x64xf32>
    %11 = tpu.matmul %9, %10, %cst_9 {dimension_numbers = #tpu.dot_dimension_numbers<[1], [0], [0], [1], [0, 0, 1, 1], [], []>} : vector<128x64xf32>, vector<64x64xf32>, vector<128x64xf32> -> vector<128x64xf32>
    %12 = vector.broadcast %3 : vector<1x64xf32> to vector<128x64xf32>
    %13 = arith.addf %11, %12 : vector<128x64xf32>
    %14 = math.tanh %13 : vector<128x64xf32>
    %c0_10 = arith.constant 0 : index
    %c0_11 = arith.constant 0 : index
    %15 = vector.load %arg4[%c0_10, %c0_11] : memref<64x64xf32, #tpu.memory_space<vmem>>, vector<64x64xf32>
    %cst_12 = arith.constant dense<0.000000e+00> : vector<128x64xf32>
    %16 = tpu.matmul %14, %15, %cst_12 {dimension_numbers = #tpu.dot_dimension_numbers<[1], [0], [0], [1], [0, 0, 1, 1], [], []>} : vector<128x64xf32>, vector<64x64xf32>, vector<128x64xf32> -> vector<128x64xf32>
    %17 = math.tanh %16 : vector<128x64xf32>
    %cst_13 = arith.constant dense<0.000000e+00> : vector<1x128xf32>
    %18 = tpu.matmul %4, %17, %cst_13 {dimension_numbers = #tpu.dot_dimension_numbers<[1], [1], [0], [0], [0, 0, 1, 0], [], []>} : vector<1x64xf32>, vector<128x64xf32>, vector<1x128xf32> -> vector<1x128xf32>
    %19 = vector.broadcast %5 : vector<1x1xf32> to vector<1x128xf32>
    %20 = arith.addf %18, %19 : vector<1x128xf32>
    %c0_14 = arith.constant 0 : index
    %c0_15 = arith.constant 0 : index
    %21 = vector.load %arg5[%c0_14, %c0_15] : memref<1x128xf32, #tpu.memory_space<vmem>>, vector<1x128xf32>
    tpu.vector_store %arg5[%c0_14, %c0_15], %20 {strides = array<i32>} : memref<1x128xf32, #tpu.memory_space<vmem>>, vector<1x128xf32>,
    return
  }
  func.func @transform_0(%arg0: i32) -> (i32, i32) {
    %c0_i32 = arith.constant 0 : i32
    %c0_i32_0 = arith.constant 0 : i32
    return %arg0, %c0_i32 : i32, i32
  }
  func.func @transform_1(%arg0: i32) -> (i32, i32) {
    %c0_i32 = arith.constant 0 : i32
    %c0_i32_0 = arith.constant 0 : i32
    %c0_i32_1 = arith.constant 0 : i32
    return %c0_i32, %c0_i32_0 : i32, i32
  }
  func.func @transform_2(%arg0: i32) -> (i32, i32) {
    %c0_i32 = arith.constant 0 : i32
    %c0_i32_0 = arith.constant 0 : i32
    %c0_i32_1 = arith.constant 0 : i32
    return %c0_i32, %c0_i32_0 : i32, i32
  }
  func.func @transform_3(%arg0: i32) -> (i32, i32) {
    %c0_i32 = arith.constant 0 : i32
    %c0_i32_0 = arith.constant 0 : i32
    %c0_i32_1 = arith.constant 0 : i32
    return %c0_i32, %c0_i32_0 : i32, i32
  }
  func.func @transform_4(%arg0: i32) -> (i32, i32) {
    %c0_i32 = arith.constant 0 : i32
    %c0_i32_0 = arith.constant 0 : i32
    return %c0_i32, %arg0 : i32, i32
  }
}

</mosaic_0001>

<bundles_post_ra>
// kernel: odd_net_forward.1
= control target key start
LH: loop header
LB: loop body
LE: loop exit
PB: predicated region body
PF: predicated region fallthrough
CT: control target
= control target key end

     0   :  { %9 = vsyncpa [#allocation3], 0  ;;  %s1622_s0 = inlined_call_operand.vmem [shape: f32[128,2], index: 0, kind: input, shape index: {}]   ;;  %s1623_s1 = inlined_call_operand.hbm [shape: f32[6,64], index: 1, kind: input, shape index: {}]   ;;  %s1624_s2 = inlined_call_operand.vmem [shape: f32[64,64], index: 2, kind: input, shape index: {}]   ;;  %s1625_s3 = inlined_call_operand.vmem [shape: f32[64,64], index: 3, kind: input, shape index: {}]   ;;  %s1626_s4 = inlined_call_operand.hbm [shape: f32[1,128], index: 4, kind: output, shape index: {}]  }
   0x1   :  { %10 = vsyncpa [#allocation4], 0  ;;  %s1356_s15 = smov [#allocation2]   ;;  %s1308_s19 = scalar_lea.hbm %s1623_s1, 128 }
   0x2   :  { %s19_s16 = sshll.u32 %s1356_s15, 4  ;;  %p1309_p0 = scmp.ne.s32.totalorder %s1623_s1, %s1308_s19  ;;  %s20_s16 = int_to_ptr.vmem [resolvable:$true] %s19_s16 }
   0x3   :  { %p1312_p1 = scmp.lt.u32.totalorder %s1308_s19, %s1623_s1 }
   0x5   :  { %p1314_p2 = pnand %p1312_p1, %p1309_p0 }
   0x7   :  { %1317 = shalt.err (!%p1314_p2)
}
   0x8   :  { %s1318_s24 = scalar_lea.vmem %s20_s16, 128  ;;  %p1323_p4 = scmp.lt.s32.totalorder %s20_s16, %s20_s16 }
   0x9   :  { %p1319_p3 = scmp.ne.s32.totalorder %s20_s16, %s1318_s24  ;;  %p1324_p5 = scmp.lt.s32.totalorder %s1318_s24, %s1318_s24 }
   0xb   :  { %p1325_p6 = por %p1324_p5, %p1323_p4 }
   0xd   :  { %p1326_p7 = pnand %p1325_p6, %p1319_p3 }
   0xf   :  { %1329 = shalt.err (!%p1326_p7)
}
  0x10   :  { %22 = dma.hbm_to_vmem [thread:$0]  %s1623_s1, 128, %s20_s16, [#allocation3]  }
  0x11   :  { %1352 = dma.done.wait [#allocation3], 128  }
  0x12   :  { %1353 = vsyncadd [#allocation3], 4294967168  ;;  %vm104_vm0 = vcmask 1041408   ;;  %vm55_vm1 = vcmask 15360   ;;  %v46_v0 = vld [vmem:[#allocation2] sm:$0x3] }
  0x13   :  { %v30_v1 = vld [vmem:[%s1622_s0] sm:$0xff]  ;;  %v31_v2 = vld [vmem:[%s1622_s0 + $0x8] sm:$0xff]  ;;  %1000 = vmatprep.subr.msk.mxu0 %vm104_vm0, %v46_v0  ;;  %v32_v3 = vld [vmem:[%s1622_s0 + $0x10] sm:$0xff]  ;;  %vm281_vm2 = vcmask 523264   ;;  %vm1358_vm3 = vmmov 0  }
  0x14   :  { %1002 = vmatprep.mubr.msk.f32.mxu0 %vm55_vm1, %v30_v1  ;;  %1001 = vmatpush3.msk.msra.mxu0 %vm104_vm0, %v46_v0  ;;  %v33_v4 = vld [vmem:[%s1622_s0 + $0x18] sm:$0xff]  ;;  %v34_v5 = vld [vmem:[%s1622_s0 + $0x20] sm:$0xff]  ;;  %v35_v6 = vld [vmem:[%s1622_s0 + $0x28] sm:$0xff] }
  0x15   :  { %1003 = vmatmul.mubr.msk.f32.vlgmr.msra.gmra.mrb[0].mxu0 %vm55_vm1, %v31_v2  ;;  %v36_v7 = vld [vmem:[%s1622_s0 + $0x30] sm:$0xff]  ;;  %v37_v8 = vld [vmem:[%s1622_s0 + $0x38] sm:$0xff]  ;;  %v38_v9 = vld [vmem:[%s1622_s0 + $0x40] sm:$0xff] }
  0x16   :  { %1005 = vmatprep.mubr.msk.f32.mxu0 %vm55_vm1, %v32_v3  ;;  %v39_v10 = vld [vmem:[%s1622_s0 + $0x48] sm:$0xff]  ;;  %v40_v11 = vld [vmem:[%s1622_s0 + $0x50] sm:$0xff]  ;;  %v41_v12 = vld [vmem:[%s1622_s0 + $0x58] sm:$0xff] }
  0x17   :  { %v42_v13 = vld [vmem:[%s1622_s0 + $0x60] sm:$0xff]  ;;  %v43_v14 = vld [vmem:[%s1622_s0 + $0x68] sm:$0xff]  ;;  %v44_v15 = vld [vmem:[%s1622_s0 + $0x70] sm:$0xff] }
  0x18   :  { %v45_v16 = vld [vmem:[%s1622_s0 + $0x78] sm:$0xff]  ;;  %v269_v17 = vld [vmem:[%s1624_s2] sm:$0xff]  ;;  %v270_v18 = vld [vmem:[%s1624_s2 + $0x8] sm:$0xff] }
  0x19   :  { %1006 = vmatmul.mubr.msk.f32.gmra.mrb[2].mxu0 %vm55_vm1, %v33_v4  ;;  %v1141_v19 = vpack.c.bf16 %v270_v18, %v269_v17  ;;  %v271_v20 = vld [vmem:[%s1624_s2 + $0x10] sm:$0xff]  ;;  %v272_v21 = vld [vmem:[%s1624_s2 + $0x18] sm:$0xff]  ;;  %v273_v23 = vld [vmem:[%s1624_s2 + $0x20] sm:$0xff] }
  0x1a   :  { %1008 = vmatprep.mubr.msk.f32.mxu0 %vm55_vm1, %v34_v5  ;;  %v1145_v22 = vpack.c.bf16 %v272_v21, %v271_v20  ;;  %v274_v24 = vld [vmem:[%s1624_s2 + $0x28] sm:$0xff]  ;;  %v275_v26 = vld [vmem:[%s1624_s2 + $0x30] sm:$0xff]  ;;  %v276_v27 = vld [vmem:[%s1624_s2 + $0x38] sm:$0xff] }
  0x1b   :  { %1142 = vmatprep.subr.bf16.mxu1 %v1141_v19  ;;  %v1149_v25 = vpack.c.bf16 %v274_v24, %v273_v23  ;;  %v1153_v28 = vpack.c.bf16 %v276_v27, %v275_v26  ;;  %v491_v29 = vld [vmem:[%s1625_s3] sm:$0xff]  ;;  %v492_v30 = vld [vmem:[%s1625_s3 + $0x8] sm:$0xff]  ;;  %v493_v31 = vld [vmem:[%s1625_s3 + $0x10] sm:$0xff] }
  0x1c   :  { %1144 = vmatpush3.bf16.msra.mxu1 %v1141_v19  ;;  %v1157_v32 = vpack.c.bf16 %v492_v30, %v491_v29  ;;  %v494_v33 = vld [vmem:[%s1625_s3 + $0x18] sm:$0xff]  ;;  %v495_v35 = vld [vmem:[%s1625_s3 + $0x20] sm:$0xff]  ;;  %v496_v36 = vld [vmem:[%s1625_s3 + $0x28] sm:$0xff] }
  0x1d   :  { %1009 = vmatmul.mubr.msk.f32.gmra.mrb[4].mxu0 %vm55_vm1, %v35_v6  ;;  %1146 = vmatprep.subr.bf16.mxu1 %v1145_v22  ;;  %v1161_v34 = vpack.c.bf16 %v494_v33, %v493_v31  ;;  %v1165_v37 = vpack.c.bf16 %v496_v36, %v495_v35  ;;  %v1505_v38 = vld [vmem:[#allocation2 + $0x2] ss:$0 sm:$0xff]  ;;  %v497_v23 = vld [vmem:[%s1625_s3 + $0x30] sm:$0xff]  ;;  %v498_v24 = vld [vmem:[%s1625_s3 + $0x38] sm:$0xff]  ;;  %s1361_s3 = smov [#allocation5]  }
  0x1e   :  { %1011 = vmatprep.mubr.msk.f32.mxu0 %vm55_vm1, %v36_v7  ;;  %1158 = vmatprep.subr.bf16.mxu0 %v1157_v32  ;;  %v1545_v26 = vld [vmem:[#allocation2 + $0x3] ss:$0 sm:$0xff]  ;;  %vm1582_vm4 = vmpackc.low %vm281_vm2, %vm281_vm2  ;;  %s841_s8 = sshll.u32 %s1361_s3, 4  ;;  %s842_s8 = int_to_ptr.vmem [resolvable:$true] %s841_s8 }
  0x1f   :  { %1160 = vmatpush3.bf16.msra.mxu0 %v1157_v32  ;;  %s1330_s9 = scalar_lea.vmem %s842_s8, 16  ;;  %s1334_s10 = scalar_lea.vmem %s842_s8, 32 }
  0x20   :  { %1148 = vmatpush3.bf16.msra.mxu1 %v1145_v22  ;;  %1162 = vmatprep.subr.bf16.mxu0 %v1161_v34  ;;  %p1331_p8 = scmp.ne.s32.totalorder %s842_s8, %s1330_s9  ;;  %p1335_p9 = scmp.lt.s32.totalorder %s842_s8, %s842_s8 }
  0x21   :  { %1012 = vmatmul.mubr.msk.f32.gmra.mrb[6].mxu0 %vm55_vm1, %v37_v8  ;;  %1150 = vmatprep.subr.bf16.mxu1 %v1149_v25  ;;  %p1336_p10 = scmp.lt.s32.totalorder %s1334_s10, %s1330_s9 }
  0x22   :  { %1014 = vmatprep.mubr.msk.f32.mxu0 %vm55_vm1, %v38_v9 }
  0x23   :  { %1164 = vmatpush3.bf16.msra.mxu0 %v1161_v34  ;;  %p1337_p11 = por %p1336_p10, %p1335_p9 }
  0x24   :  { %1152 = vmatpush3.bf16.msra.mxu1 %v1149_v25  ;;  %1166 = vmatprep.subr.bf16.mxu0 %v1165_v37  ;;  %v1169_v25 = vpack.c.bf16 %v498_v24, %v497_v23 }
  0x25   :  { %1015 = vmatmul.mubr.msk.f32.gmra.mrb[8].mxu0 %vm55_vm1, %v39_v10  ;;  %1154 = vmatprep.subr.bf16.mxu1 %v1153_v28  ;;  %p1338_p12 = pnand %p1337_p11, %p1331_p8 }
  0x26   :  { %1017 = vmatprep.mubr.msk.f32.mxu0 %vm55_vm1, %v40_v11 }
  0x27   :  { %1168 = vmatpush3.bf16.msra.mxu0 %v1165_v37 }
  0x28   :  { %1156 = vmatpush3.bf16.msra.mxu1 %v1153_v28  ;;  %1170 = vmatprep.subr.bf16.mxu0 %v1169_v25 }
  0x29   :  { %1018 = vmatmul.mubr.msk.f32.gmra.mrb[10].mxu0 %vm55_vm1, %v41_v12 }
  0x2a   :  { %1020 = vmatprep.mubr.msk.f32.mxu0 %vm55_vm1, %v42_v13 }
  0x2b   :  { %1172 = vmatpush3.bf16.msra.mxu0 %v1169_v25 }
  0x2d   :  { %1021 = vmatmul.mubr.msk.f32.gmra.mrb[12].mxu0 %vm55_vm1, %v43_v14 }
  0x2e   :  { %1023 = vmatprep.mubr.msk.f32.mxu0 %vm55_vm1, %v44_v15 }
  0x31   :  { %1024 = vmatmul.mubr.msk.f32.gmra.mrb[14].mxu0 %vm55_vm1, %v45_v16 }
  0xe8   :  { %v1004_v39 = vpop.f32.mrb[0].mxu0 }
  0xe9   :  { %v180_v40 = vadd.f32 %v1004_v39, %v1505_v38  ;;  %v174_v41 = vpop.f32.mrb[1].mxu0 }
  0xea   :  { %v175_v42 = vadd.f32 %v1505_v38, %v174_v41 }
  0xec   :  { %1212 = vtanh.f32 %v175_v42  ;;  %v1007_v43 = vpop.f32.mrb[2].mxu0 }
  0xed   :  { %1214 = vtanh.f32 %v180_v40  ;;  %v190_v44 = vadd.f32 %v1007_v43, %v1505_v38  ;;  %v184_v45 = vpop.f32.mrb[3].mxu0 }
  0xee   :  { %v185_v46 = vadd.f32 %v1505_v38, %v184_v45 }
  0xef   :  { %1216 = vtanh.f32 %v190_v44 }
  0xf0   :  { %1218 = vtanh.f32 %v185_v46  ;;  %v1010_v47 = vpop.f32.mrb[4].mxu0 }
  0xf1   :  { %v200_v48 = vadd.f32 %v1010_v47, %v1505_v38  ;;  %v194_v49 = vpop.f32.mrb[5].mxu0 }
  0xf2   :  { %v195_v50 = vadd.f32 %v1505_v38, %v194_v49 }
  0xf3   :  { %1220 = vtanh.f32 %v200_v48 }
  0xf4   :  { %1222 = vtanh.f32 %v195_v50  ;;  %v1013_v51 = vpop.f32.mrb[6].mxu0 }
  0xf5   :  { %v210_v52 = vadd.f32 %v1013_v51, %v1505_v38  ;;  %v204_v53 = vpop.f32.mrb[7].mxu0 }
  0xf6   :  { %v1213_v54 = vpop.eup %1212  ;;  %v205_v55 = vadd.f32 %v1505_v38, %v204_v53 }
  0xf7   :  { %v1215_v56 = vpop.eup %1214  ;;  %1042 = vmatprep.mubr.msk.f32.mxu1 %vm281_vm2, %v1213_v54  ;;  %1224 = vtanh.f32 %v210_v52 }
  0xf8   :  { %1043 = vmatmul.mubr.msk.f32.vlgmr.msra.gmra.mrb[0].mxu1 %vm281_vm2, %v1215_v56  ;;  %1226 = vtanh.f32 %v205_v55  ;;  %v1016_v57 = vpop.f32.mrb[8].mxu0 }
  0xf9   :  { %v1217_v58 = vpop.eup %1216  ;;  %v220_v59 = vadd.f32 %v1016_v57, %v1505_v38  ;;  %v214_v60 = vpop.f32.mrb[9].mxu0 }
  0xfa   :  { %v1219_v61 = vpop.eup %1218  ;;  %v215_v62 = vadd.f32 %v1505_v38, %v214_v60 }
  0xfb   :  { %1045 = vmatprep.mubr.msk.f32.mxu1 %vm281_vm2, %v1219_v61  ;;  %1228 = vtanh.f32 %v220_v59 }
  0xfc   :  { %1046 = vmatmul.mubr.msk.f32.gmra.mrb[2].mxu1 %vm281_vm2, %v1217_v58  ;;  %1230 = vtanh.f32 %v215_v62  ;;  %v1019_v63 = vpop.f32.mrb[10].mxu0 }
  0xfd   :  { %v1221_v0 = vpop.eup %1220  ;;  %v230_v1 = vadd.f32 %v1019_v63, %v1505_v38  ;;  %v224_v2 = vpop.f32.mrb[11].mxu0 }
  0xfe   :  { %v1223_v3 = vpop.eup %1222  ;;  %v225_v4 = vadd.f32 %v1505_v38, %v224_v2 }
  0xff   :  { %1048 = vmatprep.mubr.msk.f32.mxu1 %vm281_vm2, %v1223_v3  ;;  %1232 = vtanh.f32 %v230_v1 }
 0x100   :  { %1049 = vmatmul.mubr.msk.f32.gmra.mrb[4].mxu1 %vm281_vm2, %v1221_v0  ;;  %1234 = vtanh.f32 %v225_v4  ;;  %v1022_v5 = vpop.f32.mrb[12].mxu0 }
 0x101   :  { %v1225_v6 = vpop.eup %1224  ;;  %v240_v7 = vadd.f32 %v1022_v5, %v1505_v38  ;;  %v234_v8 = vpop.f32.mrb[13].mxu0 }
 0x102   :  { %v1227_v9 = vpop.eup %1226  ;;  %v235_v10 = vadd.f32 %v1505_v38, %v234_v8 }
 0x103   :  { %1051 = vmatprep.mubr.msk.f32.mxu1 %vm281_vm2, %v1227_v9  ;;  %1236 = vtanh.f32 %v240_v7 }
 0x104   :  { %1052 = vmatmul.mubr.msk.f32.gmra.mrb[6].mxu1 %vm281_vm2, %v1225_v6  ;;  %1238 = vtanh.f32 %v235_v10  ;;  %v1025_v11 = vpop.f32.mrb[14].mxu0 }
 0x105   :  { %v1229_v12 = vpop.eup %1228  ;;  %v250_v13 = vadd.f32 %v1025_v11, %v1505_v38  ;;  %v244_v14 = vpop.f32.mrb[15].mxu0  ;;  %v1357_v11 = vmov 0.0|0.0  }
 0x106   :  { %v1231_v15 = vpop.eup %1230  ;;  %v245_v16 = vadd.f32 %v1505_v38, %v244_v14  ;;  %1173 = vmatprep.subr.bf16.mxu1 %v1357_v11  ;;  %v1360_v14 = vmov 0  }
 0x107   :  { %1054 = vmatprep.mubr.msk.f32.mxu1 %vm281_vm2, %v1231_v15  ;;  %1240 = vtanh.f32 %v250_v13  ;;  %v50_v13 = vld [vmem:[#allocation2 + $0x5] sm:$0x1]  ;;  %1211 = vset.pattern.permute.xlu0 %v1360_v14 }
 0x108   :  { %1055 = vmatmul.mubr.msk.f32.gmra.mrb[8].mxu1 %vm281_vm2, %v1229_v12  ;;  %1242 = vtanh.f32 %v245_v16  ;;  %v1359_v12 = vmov 0.0   ;;  %710 = vperm.xlu0 %1211, %v50_v13  }
 0x109   :  { %v1233_v17 = vpop.eup %1232 }
 0x10a   :  { %v1235_v18 = vpop.eup %1234 }
 0x10b   :  { %1057 = vmatprep.mubr.msk.f32.mxu1 %vm281_vm2, %v1235_v18 }
 0x10c   :  { %1058 = vmatmul.mubr.msk.f32.gmra.mrb[10].mxu1 %vm281_vm2, %v1233_v17 }
 0x10d   :  { %v1237_v19 = vpop.eup %1236 }
 0x10e   :  { %v1239_v20 = vpop.eup %1238 }
 0x10f   :  { %1060 = vmatprep.mubr.msk.f32.mxu1 %vm281_vm2, %v1239_v20 }
 0x110   :  { %1061 = vmatmul.mubr.msk.f32.gmra.mrb[12].mxu1 %vm281_vm2, %v1237_v19 }
 0x111   :  { %v1241_v21 = vpop.eup %1240 }
 0x112   :  { %v1243_v22 = vpop.eup %1242 }
 0x113   :  { %1063 = vmatprep.mubr.msk.f32.mxu1 %vm281_vm2, %v1243_v22 }
 0x114   :  { %1064 = vmatmul.mubr.msk.f32.gmra.mrb[14].mxu1 %vm281_vm2, %v1241_v21 }
 0x115   :  { %1138 = vmatprep.mubr.msk.f32.mxu1 %vm1358_vm3, %v1359_v12 }
 0x1cb   :  { %v1044_v27 = vpop.f32.mrb[0].mxu1 }
 0x1cc   :  { %v402_v28 = vadd.f32 %v1044_v27, %v1545_v26  ;;  %v396_v29 = vpop.f32.mrb[1].mxu1 }
 0x1cd   :  { %v397_v30 = vadd.f32 %v1545_v26, %v396_v29 }
 0x1cf   :  { %1244 = vtanh.f32 %v397_v30  ;;  %v1047_v31 = vpop.f32.mrb[2].mxu1 }
 0x1d0   :  { %1246 = vtanh.f32 %v402_v28  ;;  %v412_v32 = vadd.f32 %v1047_v31, %v1545_v26  ;;  %v406_v33 = vpop.f32.mrb[3].mxu1 }
 0x1d1   :  { %v407_v34 = vadd.f32 %v1545_v26, %v406_v33 }
 0x1d2   :  { %1248 = vtanh.f32 %v412_v32 }
 0x1d3   :  { %1250 = vtanh.f32 %v407_v34  ;;  %v1050_v35 = vpop.f32.mrb[4].mxu1 }
 0x1d4   :  { %v422_v36 = vadd.f32 %v1050_v35, %v1545_v26  ;;  %v416_v37 = vpop.f32.mrb[5].mxu1 }
 0x1d5   :  { %v417_v38 = vadd.f32 %v1545_v26, %v416_v37 }
 0x1d6   :  { %1252 = vtanh.f32 %v422_v36 }
 0x1d7   :  { %1254 = vtanh.f32 %v417_v38  ;;  %v1053_v39 = vpop.f32.mrb[6].mxu1 }
 0x1d8   :  { %v432_v40 = vadd.f32 %v1053_v39, %v1545_v26  ;;  %v426_v41 = vpop.f32.mrb[7].mxu1 }
 0x1d9   :  { %v1245_v42 = vpop.eup %1244  ;;  %v427_v43 = vadd.f32 %v1545_v26, %v426_v41 }
 0x1da   :  { %v1247_v44 = vpop.eup %1246  ;;  %1082 = vmatprep.mubr.msk.f32.mxu0 %vm281_vm2, %v1245_v42  ;;  %1256 = vtanh.f32 %v432_v40 }
 0x1db   :  { %1083 = vmatmul.mubr.msk.f32.vlgmr.msra.gmra.mrb[16].mxu0 %vm281_vm2, %v1247_v44  ;;  %1258 = vtanh.f32 %v427_v43  ;;  %v1056_v45 = vpop.f32.mrb[8].mxu1 }
 0x1dc   :  { %v1249_v46 = vpop.eup %1248  ;;  %v442_v47 = vadd.f32 %v1056_v45, %v1545_v26  ;;  %v436_v48 = vpop.f32.mrb[9].mxu1 }
 0x1dd   :  { %v1251_v49 = vpop.eup %1250  ;;  %v437_v50 = vadd.f32 %v1545_v26, %v436_v48 }
 0x1de   :  { %1085 = vmatprep.mubr.msk.f32.mxu0 %vm281_vm2, %v1251_v49  ;;  %1260 = vtanh.f32 %v442_v47 }
 0x1df   :  { %1086 = vmatmul.mubr.msk.f32.gmra.mrb[18].mxu0 %vm281_vm2, %v1249_v46  ;;  %1262 = vtanh.f32 %v437_v50  ;;  %v1059_v51 = vpop.f32.mrb[10].mxu1 }
 0x1e0   :  { %v1253_v52 = vpop.eup %1252  ;;  %v452_v53 = vadd.f32 %v1059_v51, %v1545_v26  ;;  %v446_v54 = vpop.f32.mrb[11].mxu1 }
 0x1e1   :  { %v1255_v55 = vpop.eup %1254  ;;  %v447_v56 = vadd.f32 %v1545_v26, %v446_v54 }
 0x1e2   :  { %1088 = vmatprep.mubr.msk.f32.mxu0 %vm281_vm2, %v1255_v55  ;;  %1264 = vtanh.f32 %v452_v53 }
 0x1e3   :  { %1089 = vmatmul.mubr.msk.f32.gmra.mrb[20].mxu0 %vm281_vm2, %v1253_v52  ;;  %1266 = vtanh.f32 %v447_v56  ;;  %v1062_v57 = vpop.f32.mrb[12].mxu1  ;;  %v49_v56 = vld [vmem:[#allocation2 + $0x4] sm:$0x1] }
 0x1e4   :  { %v1257_v58 = vpop.eup %1256  ;;  %v462_v59 = vadd.f32 %v1062_v57, %v1545_v26  ;;  %v456_v60 = vpop.f32.mrb[13].mxu1 }
 0x1e5   :  { %v1259_v61 = vpop.eup %1258  ;;  %v457_v62 = vadd.f32 %v1545_v26, %v456_v60  ;;  %v711_v57 = vpop.permute.xlu0 %710 }
 0x1e6   :  { %1091 = vmatprep.mubr.msk.f32.mxu0 %vm281_vm2, %v1259_v61  ;;  %1268 = vtanh.f32 %v462_v59 }
 0x1e7   :  { %1092 = vmatmul.mubr.msk.f32.gmra.mrb[22].mxu0 %vm281_vm2, %v1257_v58  ;;  %1270 = vtanh.f32 %v457_v62  ;;  %v1065_v63 = vpop.f32.mrb[14].mxu1 }
 0x1e8   :  { %v1261_v0 = vpop.eup %1260  ;;  %v472_v1 = vadd.f32 %v1065_v63, %v1545_v26  ;;  %v466_v2 = vpop.f32.mrb[15].mxu1 }
 0x1e9   :  { %v1263_v3 = vpop.eup %1262  ;;  %v467_v4 = vadd.f32 %v1545_v26, %v466_v2 }
 0x1ea   :  { %1094 = vmatprep.mubr.msk.f32.mxu0 %vm281_vm2, %v1263_v3  ;;  %1272 = vtanh.f32 %v472_v1 }
 0x1eb   :  { %1095 = vmatmul.mubr.msk.f32.gmra.mrb[24].mxu0 %vm281_vm2, %v1261_v0  ;;  %1274 = vtanh.f32 %v467_v4 }
 0x1ec   :  { %v1265_v5 = vpop.eup %1264 }
 0x1ed   :  { %v1267_v6 = vpop.eup %1266 }
 0x1ee   :  { %1097 = vmatprep.mubr.msk.f32.mxu0 %vm281_vm2, %v1267_v6 }
 0x1ef   :  { %1098 = vmatmul.mubr.msk.f32.gmra.mrb[26].mxu0 %vm281_vm2, %v1265_v5 }
 0x1f0   :  { %v1269_v7 = vpop.eup %1268 }
 0x1f1   :  { %v1271_v8 = vpop.eup %1270 }
 0x1f2   :  { %1100 = vmatprep.mubr.msk.f32.mxu0 %vm281_vm2, %v1271_v8 }
 0x1f3   :  { %1101 = vmatmul.mubr.msk.f32.gmra.mrb[28].mxu0 %vm281_vm2, %v1269_v7 }
 0x1f4   :  { %v1273_v9 = vpop.eup %1272 }
 0x1f5   :  { %v1275_v10 = vpop.eup %1274 }
 0x1f6   :  { %1103 = vmatprep.mubr.msk.f32.mxu0 %vm281_vm2, %v1275_v10 }
 0x1f7   :  { %1104 = vmatmul.mubr.msk.f32.gmra.mrb[30].mxu0 %vm281_vm2, %v1273_v9 }
 0x2ae   :  { %v1084_v15 = vpop.f32.mrb[16].mxu0 }
 0x2af   :  { %1276 = vtanh.f32 %v1084_v15  ;;  %v613_v16 = vpop.f32.mrb[17].mxu0 }
 0x2b0   :  { %1278 = vtanh.f32 %v613_v16 }
 0x2b2   :  { %v1087_v17 = vpop.f32.mrb[18].mxu0 }
 0x2b3   :  { %1280 = vtanh.f32 %v1087_v17  ;;  %v623_v18 = vpop.f32.mrb[19].mxu0 }
 0x2b4   :  { %1282 = vtanh.f32 %v623_v18 }
 0x2b6   :  { %v1090_v19 = vpop.f32.mrb[20].mxu0 }
 0x2b7   :  { %1284 = vtanh.f32 %v1090_v19  ;;  %v633_v20 = vpop.f32.mrb[21].mxu0 }
 0x2b8   :  { %1286 = vtanh.f32 %v633_v20 }
 0x2b9   :  { %v1277_v21 = vpop.eup %1276 }
 0x2ba   :  { %v1279_v22 = vpop.eup %1278  ;;  %v1093_v24 = vpop.f32.mrb[22].mxu0 }
 0x2bb   :  { %v1174_v25 = vpack.c.bf16 %v1277_v21, %v1279_v22  ;;  %1288 = vtanh.f32 %v1093_v24  ;;  %v643_v26 = vpop.f32.mrb[23].mxu0 }
 0x2bc   :  { %1290 = vtanh.f32 %v643_v26 }
 0x2bd   :  { %v1281_v27 = vpop.eup %1280  ;;  %1176 = vmatpush3.bf16.xpose.msk.msra.mxu1 %vm1582_vm4, %v1174_v25 }
 0x2be   :  { %v1283_v28 = vpop.eup %1282  ;;  %1177 = vmatprep.subr.bf16.mxu1 %v1357_v11  ;;  %v1096_v29 = vpop.f32.mrb[24].mxu0 }
 0x2bf   :  { %v1178_v30 = vpack.c.bf16 %v1281_v27, %v1283_v28  ;;  %1292 = vtanh.f32 %v1096_v29  ;;  %v653_v31 = vpop.f32.mrb[25].mxu0 }
 0x2c0   :  { %1294 = vtanh.f32 %v653_v31 }
 0x2c1   :  { %v1285_v32 = vpop.eup %1284 }
 0x2c2   :  { %v1287_v33 = vpop.eup %1286  ;;  %v1099_v34 = vpop.f32.mrb[26].mxu0 }
 0x2c3   :  { %v1182_v35 = vpack.c.bf16 %v1285_v32, %v1287_v33  ;;  %1296 = vtanh.f32 %v1099_v34  ;;  %v663_v36 = vpop.f32.mrb[27].mxu0 }
 0x2c4   :  { %1298 = vtanh.f32 %v663_v36 }
 0x2c5   :  { %v1289_v37 = vpop.eup %1288  ;;  %1180 = vmatpush3.bf16.xpose.msk.msra.mxu1 %vm1582_vm4, %v1178_v30 }
 0x2c6   :  { %v1291_v38 = vpop.eup %1290  ;;  %1181 = vmatprep.subr.bf16.mxu1 %v1357_v11  ;;  %v1102_v39 = vpop.f32.mrb[28].mxu0 }
 0x2c7   :  { %v1186_v40 = vpack.c.bf16 %v1289_v37, %v1291_v38  ;;  %1300 = vtanh.f32 %v1102_v39  ;;  %v673_v41 = vpop.f32.mrb[29].mxu0 }
 0x2c8   :  { %1302 = vtanh.f32 %v673_v41 }
 0x2c9   :  { %v1293_v42 = vpop.eup %1292 }
 0x2ca   :  { %v1295_v43 = vpop.eup %1294  ;;  %v1105_v44 = vpop.f32.mrb[30].mxu0 }
 0x2cb   :  { %v1190_v45 = vpack.c.bf16 %v1293_v42, %v1295_v43  ;;  %1304 = vtanh.f32 %v1105_v44  ;;  %v683_v46 = vpop.f32.mrb[31].mxu0 }
 0x2cc   :  { %1306 = vtanh.f32 %v683_v46 }
 0x2cd   :  { %v1297_v47 = vpop.eup %1296  ;;  %1184 = vmatpush3.bf16.xpose.msk.msra.mxu1 %vm1582_vm4, %v1182_v35 }
 0x2ce   :  { %v1299_v48 = vpop.eup %1298  ;;  %1185 = vmatprep.subr.bf16.mxu1 %v1357_v11 }
 0x2cf   :  { %v1194_v49 = vpack.c.bf16 %v1297_v47, %v1299_v48 }
 0x2d1   :  { %v1301_v50 = vpop.eup %1300 }
 0x2d2   :  { %v1303_v51 = vpop.eup %1302 }
 0x2d3   :  { %v1198_v52 = vpack.c.bf16 %v1301_v50, %v1303_v51 }
 0x2d5   :  { %v1305_v53 = vpop.eup %1304  ;;  %1188 = vmatpush3.bf16.xpose.msk.msra.mxu1 %vm1582_vm4, %v1186_v40 }
 0x2d6   :  { %v1307_v54 = vpop.eup %1306  ;;  %1189 = vmatprep.subr.bf16.mxu1 %v1357_v11 }
 0x2d7   :  { %v1202_v55 = vpack.c.bf16 %v1305_v53, %v1307_v54 }
 0x2dd   :  { %1192 = vmatpush3.bf16.xpose.msk.msra.mxu1 %vm1582_vm4, %v1190_v45 }
 0x2de   :  { %1193 = vmatprep.subr.bf16.mxu1 %v1357_v11 }
 0x2e5   :  { %1196 = vmatpush3.bf16.xpose.msk.msra.mxu1 %vm1582_vm4, %v1194_v49 }
 0x2e6   :  { %1197 = vmatprep.subr.bf16.mxu1 %v1357_v11 }
 0x2ed   :  { %1200 = vmatpush3.bf16.xpose.msk.msra.mxu1 %vm1582_vm4, %v1198_v52 }
 0x2ee   :  { %1201 = vmatprep.subr.bf16.mxu1 %v1357_v11 }
 0x2f5   :  { %1204 = vmatpush3.bf16.xpose.msk.msra.mxu1 %vm1582_vm4, %v1202_v55 }
 0x2fc   :  { %1139 = vmatmul.mubr.msk.f32.vlgmr.msra.gmra.mrb[16].mxu1 %vm281_vm2, %v49_v56 }
 0x3cf   :  { %v830_v58 = vpop.f32.mrb[16].mxu1 }
 0x3d0   :  { %v831_v59 = vadd.f32 %v830_v58, %v711_v57  ;;  %v1140_v60 = vpop.f32.mrb[17].mxu1 }
 0x3d2   :  { %834 = vst [vmem:[#allocation5] sm:$0x1] %v831_v59 }
 0x3d3   :  { %1341 = shalt.err (!%p1338_p12)
}
 0x3d4   :  { %s1342_s0 = scalar_lea.hbm %s1626_s4, 16 }
 0x3d5   :  { %p1343_p13 = scmp.ne.s32.totalorder %s1626_s4, %s1342_s0  ;;  %p1346_p0 = scmp.lt.u32.totalorder %s1342_s0, %s1626_s4 }
 0x3d7   :  { %p1348_p1 = pnand %p1346_p0, %p1343_p13 }
 0x3d9   :  { %1351 = shalt.err (!%p1348_p1)
}
 0x3da   :  { %844 = dma.vmem_to_hbm [thread:$0]  %s842_s8, 16, %s1626_s4, [#allocation4]  }
 0x3db   :  { %1354 = dma.done.wait [#allocation4], 16  }
 0x3dc   :  { %1355 = vsyncadd [#allocation4], 4294967280 }
 0x3dd   :  { %848 = vsyncpa [#allocation3], 1 }
 0x3de   :  { %849 = vsyncpa [#allocation4], 1 }

</bundles_post_ra>
